<compile_context>
chip_gen: v5e
topology: v5e:2x2
jax: 0.10.0
libtpu: 0.0.40
codegen_flags: <defaults>
</compile_context>

<pallas_src>
import functools

import jax
import jax.numpy as jnp
from jax import lax
from jax.experimental import pallas as pl
from jax.experimental.pallas import tpu as pltpu


def _round_up(x, m):
    return ((x + m - 1) // m) * m


def _cdiv(a, b):
    return -(-a // b)


def _vmem_limit_bytes():
    """Generation-aware VMEM limit (~3/4 of physical capacity)."""
    try:
        cap = int(pltpu.get_tpu_info().vmem_capacity_bytes)
    except Exception:
        cap = 64 * 1024 * 1024          # conservative fallback (v7x physical VMEM)
    return max(32 * 1024 * 1024, (cap * 3) // 4)


def _choose_tiles(b, c, hw, x_itemsize, nc_pad, param_itemsize, out_itemsize,
                  vmem_limit):
    """Pick (TB, THW).

    THW (contiguous DMA run length) is grown first — ideally THW == HW so the whole
    reduction is a single grid step — and TB is shrunk only when the full-buffer
    accounting does not fit.  TB is a leading block dim (unconstrained by the (8,128)
    rule), so we keep >= 2 batch tiles whenever B >= 2 for v7x megacore sharding.
    """
    budget = int(vmem_limit * 0.8)       # headroom for compiler-internal scratch

    tb = min(b, 8)                       # TB > 8 buys nothing (epilogue matmul is tiny)
    if b >= 2:
        tb = min(tb, _cdiv(b, 2))        # guarantee >= 2 parallel batch tiles

    def fixed_bytes(tb_):
        w = 2 * c * nc_pad * param_itemsize          # weight block (double-buffered)
        bias = 2 * nc_pad * param_itemsize
        acc = tb_ * c * 128 * 4                      # f32 lane-resident accumulator
        out = 2 * tb_ * nc_pad * out_itemsize
        return w + bias + acc + out

    while True:
        x_budget = budget - fixed_bytes(tb)
        per_buf = x_budget // 2 if x_budget > 0 else 0   # x tile is double-buffered
        max_lanes = per_buf // max(1, tb * c * x_itemsize)
        if hw <= max_lanes:
            return tb, hw                # full-HW tile: single reduction step, no tail
        if max_lanes >= 128:
            thw = min((max_lanes // 128) * 128, (hw // 128) * 128)
            return tb, max(thw, 128)
        if tb > 1:
            tb = max(1, tb // 2)
            continue
        # Last resort (extremely large C): smallest legal tile.  A gigantic C*NC weight
        # may still exceed VMEM; tiling C/NC is out of scope for a classification head.
        return 1, hw if hw < 128 else 128


def _classify_kernel(x_ref, w_ref, b_ref, o_ref, acc_ref, *, hw, thw, inv_hw):
    # x_ref: (TB, C, THW)   w_ref: (C, NC_pad)   b_ref: (1, NC_pad)
    # o_ref: (TB, 1, NC_pad)   acc_ref: (TB, C, 128) f32 (grid-resident scratch)
    k = pl.program_id(1)
    nk = _cdiv(hw, thw)                  # static
    tail = hw - (nk - 1) * thw           # static: valid lanes of the last HW tile

    @pl.when(k == 0)
    def _():
        acc_ref[...] = jnp.zeros_like(acc_ref)

    def accumulate(valid):
        # Pure VPU adds on lane-aligned 128-wide chunks of the x tile: no per-step
        # cross-lane (XLU) reduce/relayout, and no reads of out-of-bounds lanes.
        n_full = valid // 128
        rem = valid - n_full * 128
        if n_full > 0:
            if n_full <= 16:                         # short: statically unrolled
                for j in range(n_full):
                    acc_ref[...] += x_ref[:, :, j * 128:(j + 1) * 128].astype(jnp.float32)
            else:                                    # long: rolled loop, dynamic slice
                def body(j, carry):
                    off = pl.multiple_of(j * 128, 128)
                    acc_ref[...] += x_ref[:, :, pl.ds(off, 128)].astype(jnp.float32)
                    return carry
                lax.fori_loop(0, n_full, body, 0)
        if rem > 0:
            base = n_full * 128
            acc_ref[:, :, :rem] += x_ref[:, :, base:base + rem].astype(jnp.float32)

    if tail == thw:                      # HW % THW == 0: every tile is full
        accumulate(thw)
    else:
        @pl.when(k < nk - 1)
        def _():
            accumulate(thw)

        @pl.when(k == nk - 1)
        def _():
            accumulate(tail)             # static slice of valid lanes only (tail mask)

    @pl.when(k == nk - 1)
    def _():
        # Epilogue: single cross-lane reduce, mean scale, FC matmul, bias add.
        pooled = jnp.sum(acc_ref[...], axis=-1) * inv_hw          # (TB, C) f32
        # Dropout(p=0.0) is the identity.  MXU operands in the weight's dtype
        # (bf16 weights stay bf16; slight precision loss vs an fp32-master reference).
        out = jnp.dot(pooled.astype(w_ref.dtype), w_ref[...],
                      preferred_element_type=jnp.float32)         # (TB, NC_pad)
        o_ref[:, 0, :] = (out + b_ref[...].astype(jnp.float32)).astype(o_ref.dtype)


def classify_forward(x, weight, bias, *, tiles=None):
    """x: (B, C, H, W); weight: (num_classes, C); bias: (num_classes,)."""
    B, C, H, W = x.shape
    num_classes = weight.shape[0]
    HW = H * W

    nc_pad = _round_up(num_classes, 128)        # lane-dense output; pads tiny params only
    vmem_limit = _vmem_limit_bytes()
    if tiles is None:
        TB, THW = _choose_tiles(B, C, HW, x.dtype.itemsize, nc_pad,
                                weight.dtype.itemsize, x.dtype.itemsize, vmem_limit)
    else:
        TB, THW = tiles                         # test/override hook

    # Metadata-only reshape of the activation (no extra HBM pass); only the small FC
    # parameters are padded to the lane-dense NC_pad width.
    x_flat = x.reshape(B, C, HW)
    w_t = jnp.pad(weight.T, ((0, 0), (0, nc_pad - num_classes)))   # (C, NC_pad)
    b2 = jnp.pad(bias, (0, nc_pad - num_classes)).reshape(1, nc_pad)

    grid = (_cdiv(B, TB), _cdiv(HW, THW))

    out = pl.pallas_call(
        functools.partial(_classify_kernel, hw=HW, thw=THW, inv_hw=1.0 / float(HW)),
        out_shape=jax.ShapeDtypeStruct((B, 1, nc_pad), x.dtype),
        grid_spec=pltpu.PrefetchScalarGridSpec(
            num_scalar_prefetch=0,
            grid=grid,
            in_specs=[
                # Activation tiles stream over (batch, HW); Pallas double-buffers them.
                pl.BlockSpec((TB, C, THW), lambda b, k: (b, 0, k)),
                # Weight / bias: grid-invariant index_map -> DMA'd once, VMEM-resident.
                pl.BlockSpec((C, nc_pad), lambda b, k: (0, 0)),
                pl.BlockSpec((1, nc_pad), lambda b, k: (0, 0)),
            ],
            # Same output block across k -> resident accumulator pattern, written only in
            # the epilogue.  Out-of-bounds rows of a partial batch tile are dropped.
            out_specs=pl.BlockSpec((TB, 1, nc_pad), lambda b, k: (b, 0, 0)),
            scratch_shapes=[pltpu.VMEM((TB, C, 128), jnp.float32)],
        ),
        compiler_params=pltpu.CompilerParams(
            dimension_semantics=("parallel", "arbitrary"),
            vmem_limit_bytes=vmem_limit,
        ),
    )(x_flat, w_t, b2)

    return out[:, 0, :num_classes]


if __name__ == "__main__":
    B, C, H, W = 2, 4, 16, 16
    NUM_CLASSES = 8

    key = jax.random.PRNGKey(0)
    kx, kw, kb = jax.random.split(key, 3)

    x = jax.random.normal(kx, (B, C, H, W), dtype=jnp.float32)
    # Deterministic params mimicking nn.Linear's uniform(-1/sqrt(C), 1/sqrt(C)) init.
    bound = 1.0 / (C ** 0.5)
    weight = jax.random.uniform(kw, (NUM_CLASSES, C), minval=-bound, maxval=bound,
                                dtype=jnp.float32)
    bias = jax.random.uniform(kb, (NUM_CLASSES,), minval=-bound, maxval=bound,
                              dtype=jnp.float32)

    out = jax.block_until_ready(classify_forward(x, weight, bias))
    ref = jnp.mean(x, axis=(2, 3)) @ weight.T + bias
    assert out.shape == (B, NUM_CLASSES)
    assert jnp.allclose(out, ref, atol=1e-5, rtol=1e-5)

    # Ragged-shape check: B=3 with TB=2 (partial batch tile) and HW=169 with THW=128
    # (masked HW tail tile) — exercises the no-pad boundary handling paths.
    x2 = jax.random.normal(kx, (3, 4, 13, 13), dtype=jnp.float32)
    out2 = jax.block_until_ready(classify_forward(x2, weight, bias, tiles=(2, 128)))
    ref2 = jnp.mean(x2, axis=(2, 3)) @ weight.T + bias
    assert out2.shape == (3, NUM_CLASSES)
    assert jnp.allclose(out2, ref2, atol=1e-5, rtol=1e-5)

    print("KERNEL_OK")
</pallas_src>

<mosaic_0001>
module attributes {stable_mosaic.version = 11 : i64} {
  func.func @_classify_kernel(%arg0: i32, %arg1: i32, %arg2: memref<1x4x256xf32, #tpu.memory_space<vmem>>, %arg3: memref<4x128xf32, #tpu.memory_space<vmem>>, %arg4: memref<1x128xf32, #tpu.memory_space<vmem>>, %arg5: memref<1x1x128xf32, #tpu.memory_space<vmem>>, %arg6: memref<1x4x128xf32, #tpu.memory_space<vmem>>) attributes {dimension_semantics = [#tpu.dimension_semantics<parallel>, #tpu.dimension_semantics<arbitrary>], iteration_bounds = array<i64: 2, 1>, scalar_prefetch = 0 : i64, scratch_operands = 1 : i64, tpu.core_type = #tpu.core_type<tc>, window_params = [{transform_indices = @transform_0, window_bounds = array<i64: 1, 4, 256>}, {pipeline_mode = #tpu.pipeline_mode<synchronous>, transform_indices = @transform_1, window_bounds = array<i64: 4, 128>}, {pipeline_mode = #tpu.pipeline_mode<synchronous>, transform_indices = @transform_2, window_bounds = array<i64: 1, 128>}, {transform_indices = @transform_3, window_bounds = array<i64: 1, 1, 128>}]} {
    %c0_i32 = arith.constant 0 : i32
    %0 = arith.cmpi eq, %arg1, %c0_i32 : i32
    %1 = arith.extui %0 : i1 to i32
    %c0_i32_0 = arith.constant 0 : i32
    %2 = arith.cmpi ne, %1, %c0_i32_0 : i32
    scf.if %2 {
      %cst = arith.constant 0.000000e+00 : f32
      %14 = vector.broadcast %cst : f32 to vector<1x4x128xf32>
      %c0_19 = arith.constant 0 : index
      %c0_20 = arith.constant 0 : index
      %c0_21 = arith.constant 0 : index
      %15 = vector.load %arg6[%c0_19, %c0_20, %c0_21] : memref<1x4x128xf32, #tpu.memory_space<vmem>>, vector<1x4x128xf32>
      tpu.vector_store %arg6[%c0_19, %c0_20, %c0_21], %14 {strides = array<i32>} : memref<1x4x128xf32, #tpu.memory_space<vmem>>, vector<1x4x128xf32>,
    } else {
    }
    %c0 = arith.constant 0 : index
    %c0_1 = arith.constant 0 : index
    %c0_2 = arith.constant 0 : index
    %3 = vector.load %arg6[%c0, %c0_1, %c0_2] : memref<1x4x128xf32, #tpu.memory_space<vmem>>, vector<1x4x128xf32>
    %c0_3 = arith.constant 0 : index
    %c0_4 = arith.constant 0 : index
    %c0_5 = arith.constant 0 : index
    %4 = vector.load %arg2[%c0_3, %c0_4, %c0_5] : memref<1x4x256xf32, #tpu.memory_space<vmem>>, vector<1x4x128xf32>
    %5 = arith.addf %3, %4 : vector<1x4x128xf32>
    %c0_6 = arith.constant 0 : index
    %c0_7 = arith.constant 0 : index
    %c0_8 = arith.constant 0 : index
    %6 = vector.load %arg6[%c0_6, %c0_7, %c0_8] : memref<1x4x128xf32, #tpu.memory_space<vmem>>, vector<1x4x128xf32>
    tpu.vector_store %arg6[%c0_6, %c0_7, %c0_8], %5 {strides = array<i32>} : memref<1x4x128xf32, #tpu.memory_space<vmem>>, vector<1x4x128xf32>,
    %c0_9 = arith.constant 0 : index
    %c0_10 = arith.constant 0 : index
    %c0_11 = arith.constant 0 : index
    %7 = vector.load %arg6[%c0_9, %c0_10, %c0_11] : memref<1x4x128xf32, #tpu.memory_space<vmem>>, vector<1x4x128xf32>
    %c0_12 = arith.constant 0 : index
    %c0_13 = arith.constant 0 : index
    %c128 = arith.constant 128 : index
    %8 = vector.load %arg2[%c0_12, %c0_13, %c128] : memref<1x4x256xf32, #tpu.memory_space<vmem>>, vector<1x4x128xf32>
    %9 = arith.addf %7, %8 : vector<1x4x128xf32>
    %c0_14 = arith.constant 0 : index
    %c0_15 = arith.constant 0 : index
    %c0_16 = arith.constant 0 : index
    %10 = vector.load %arg6[%c0_14, %c0_15, %c0_16] : memref<1x4x128xf32, #tpu.memory_space<vmem>>, vector<1x4x128xf32>
    tpu.vector_store %arg6[%c0_14, %c0_15, %c0_16], %9 {strides = array<i32>} : memref<1x4x128xf32, #tpu.memory_space<vmem>>, vector<1x4x128xf32>,
    %c0_i32_17 = arith.constant 0 : i32
    %11 = arith.cmpi eq, %arg1, %c0_i32_17 : i32
    %12 = arith.extui %11 : i1 to i32
    %c0_i32_18 = arith.constant 0 : i32
    %13 = arith.cmpi ne, %12, %c0_i32_18 : i32
    scf.if %13 {
      %c0_19 = arith.constant 0 : index
      %c0_20 = arith.constant 0 : index
      %c0_21 = arith.constant 0 : index
      %14 = vector.load %arg6[%c0_19, %c0_20, %c0_21] : memref<1x4x128xf32, #tpu.memory_space<vmem>>, vector<1x4x128xf32>
      %cst = arith.constant dense<0.000000e+00> : vector<1x4xf32>
      %15 = vector.multi_reduction <add>, %14, %cst [2] : vector<1x4x128xf32> to vector<1x4xf32>
      %cst_22 = arith.constant 3.906250e-03 : f32
      %16 = vector.broadcast %cst_22 : f32 to vector<1x4xf32>
      %17 = arith.mulf %15, %16 : vector<1x4xf32>
      %c0_23 = arith.constant 0 : index
      %c0_24 = arith.constant 0 : index
      %18 = vector.load %arg3[%c0_23, %c0_24] : memref<4x128xf32, #tpu.memory_space<vmem>>, vector<4x128xf32>
      %cst_25 = arith.constant dense<0.000000e+00> : vector<1x128xf32>
      %19 = tpu.matmul %17, %18, %cst_25 {dimension_numbers = #tpu.dot_dimension_numbers<[1], [0], [0], [1], [0, 0, 1, 1], [], []>} : vector<1x4xf32>, vector<4x128xf32>, vector<1x128xf32> -> vector<1x128xf32>
      %c0_26 = arith.constant 0 : index
      %c0_27 = arith.constant 0 : index
      %20 = vector.load %arg4[%c0_26, %c0_27] : memref<1x128xf32, #tpu.memory_space<vmem>>, vector<1x128xf32>
      %21 = arith.addf %19, %20 : vector<1x128xf32>
      %c0_28 = arith.constant 0 : index
      %c0_29 = arith.constant 0 : index
      %c0_30 = arith.constant 0 : index
      %22 = vector.load %arg5[%c0_28, %c0_29, %c0_30] : memref<1x1x128xf32, #tpu.memory_space<vmem>>, vector<1x1x128xf32>
      %23 = vector.shape_cast %22 : vector<1x1x128xf32> to vector<1x128xf32>
      %24 = vector.shape_cast %21 : vector<1x128xf32> to vector<1x1x128xf32>
      tpu.vector_store %arg5[%c0_28, %c0_29, %c0_30], %24 {strides = array<i32>} : memref<1x1x128xf32, #tpu.memory_space<vmem>>, vector<1x1x128xf32>,
    } else {
    }
    return
  }
  func.func @transform_0(%arg0: i32, %arg1: i32) -> (i32, i32, i32) {
    %c0_i32 = arith.constant 0 : i32
    %c0_i32_0 = arith.constant 0 : i32
    return %arg0, %c0_i32, %arg1 : i32, i32, i32
  }
  func.func @transform_1(%arg0: i32, %arg1: i32) -> (i32, i32) {
    %c0_i32 = arith.constant 0 : i32
    %c0_i32_0 = arith.constant 0 : i32
    %c0_i32_1 = arith.constant 0 : i32
    return %c0_i32, %c0_i32_0 : i32, i32
  }
  func.func @transform_2(%arg0: i32, %arg1: i32) -> (i32, i32) {
    %c0_i32 = arith.constant 0 : i32
    %c0_i32_0 = arith.constant 0 : i32
    %c0_i32_1 = arith.constant 0 : i32
    return %c0_i32, %c0_i32_0 : i32, i32
  }
  func.func @transform_3(%arg0: i32, %arg1: i32) -> (i32, i32, i32) {
    %c0_i32 = arith.constant 0 : i32
    %c0_i32_0 = arith.constant 0 : i32
    %c0_i32_1 = arith.constant 0 : i32
    return %arg0, %c0_i32, %c0_i32_0 : i32, i32, i32
  }
}

</mosaic_0001>

<bundles_post_ra>
// kernel: tpu_custom_call.1
= control target key start
LH: loop header
LB: loop body
LE: loop exit
PB: predicated region body
PF: predicated region fallthrough
CT: control target
= control target key end

     0   :  { %8 = vsyncpa [#allocation4], 0  ;;  %s788_s0 = inlined_call_operand.hbm [shape: f32[2,4,256], index: 0, kind: input, shape index: {}]   ;;  %s789_s1 = inlined_call_operand.hbm [shape: f32[4,128], index: 1, kind: input, shape index: {}]   ;;  %s790_s2 = inlined_call_operand.vmem [shape: f32[1,128], index: 2, kind: input, shape index: {}]   ;;  %s791_s3 = inlined_call_operand.hbm [shape: f32[2,1,128], index: 3, kind: output, shape index: {}]  }
   0x1   :  { %10 = vsyncpa [#allocation4 + $0x1], 0 }
   0x2   :  { %11 = vsyncpa [#allocation7], 0 }
   0x3   :  { %12 = vsyncpa [#allocation5], 0 }
   0x4   :  { %14 = vsyncpa [#allocation5 + $0x1], 0  ;;  %s635_s12 = smov 0   ;;  %s637_s13 = smov 0  }
   0x5   :  { %s639_s14 = smov 0   ;;  %s641_s15 = smov 0  }
   0x6   :  { %s643_s16 = smov 0   ;;  %s645_s17 = smov 0  }
   0x7 LB: > { %s375_s18 = sadd.s32 4294967295, %s611_s17   ;;  %s376_s19 = sadd.s32 4294967294, %s611_s17   ;;  %s611_s17 = sphi %s645_s17, %s20_s17   ;;  %s607_s16 = sphi %s643_s16, %s803_s16   ;;  %s603_s15 = sphi %s641_s15, %s802_s15   ;;  %s599_s14 = sphi %s639_s14, %s801_s14   ;;  %s595_s13 = sphi %s637_s13, %s800_s13   ;;  %s591_s12 = sphi %s635_s12, %s799_s12  }
   0x8   : > { %p54_p0 = scmp.ne.s32.totalorder %s595_s13, %s591_s12  ;;  %p669_p1 = scmp.eq.s32.totalorder %s375_s18, 0 }
   0x9   : > { %p673_p2 = scmp.eq.s32.totalorder %s375_s18, 1  ;;  %p126_p3 = scmp.eq.s32.totalorder %s376_s19, 1 }
   0xa   : > { %p679_p4 = por %p669_p1, %p54_p0  ;;  %p377_p5 = scmp.ge.s32.totalorder %s611_s17, 1 }
   0xb   : > { %p684_p6 = por %p126_p3, %p54_p0  ;;  %p133_p7 = scmp.lt.s32.totalorder %s611_s17, 3 }
   0xc   : > { %s145_s26 = sshll.u32 %s789_s1, 4  ;;  %p379_p9 = scmp.ge.s32.totalorder %s611_s17, 2  ;;  %s146_s26 = int_to_ptr.hbm [resolvable:$true] %s145_s26 }
   0xd   : > { %p692_p8 = pnand %p377_p5, %p133_p7  ;;  %s613_s28 = smov [#allocation6]  }
   0xe   : > { %s147_s29 = sshll.u32 %s613_s28, 4  ;;  %s32_s30 = sadd.s32 1, %s607_s16  ;;  %s148_s29 = int_to_ptr.vmem [resolvable:$true] %s147_s29 }
   0xf   : > { %p399_p10 = pneg %p692_p8  ;;  %p34_p12 = scmp.ge.s32.totalorder %s32_s30, 2 }
  0x10   : > { %s41_s4 = sadd.s32 1, %s599_s14  ;;  %p48_p13 = scmp.ne.s32.totalorder %s599_s14, %s595_s13 }
  0x11   : > { %p400_p11 = pnand %p399_p10, %p669_p1  ;;  %p49_p0 = scmp.eq.s32.totalorder %s611_s17, 0 }
  0x12   : > { %s805_s30 = smov (%p34_p12, %s32_s30), 0  ;;  %p714_p5 = por %p673_p2, %p48_p13 }
  0x13   : > { %402 = dma.hbm_to_vmem [thread:$0]  (!%p400_p11), %s146_s26, 64, %s148_s29, [#allocation7]  }
  0x14   : > { %p708_p3 = por %p49_p0, %p48_p13  ;;  %s36_s7 = ssub.s32 %s607_s16, %s805_s30 }
  0x15   : > { %p412_p7 = scmp.lt.s32.totalorder %s611_s17, 2  ;;  %p39_p10 = scmp.eq.s32.totalorder %s36_s7, 0 }
  0x16   : > { %s161_s8 = sand.u32 1, %s599_s14   ;;  %s390_s11 = sshll.u32 %s607_s16, 3 }
  0x17   : > { %s380_s9 = sshll.u32 %s161_s8, 3  ;;  %s172_s24 = scalar_lea.hbm %s788_s0, %s390_s11 }
  0x18   : > { %s723_s10 = scalar_select %p39_p10, %s599_s14, %s41_s4  }
  0x19   : > { %s165_s25 = scalar_lea.vmem [#allocation3], %s380_s9  ;;  %s174_s21 = sshll.u32 %s172_s24, 4  ;;  %s175_s21 = int_to_ptr.hbm [resolvable:$true] %s174_s21 }
  0x1a   : > { %s176_s26 = sshll.u32 %s165_s25, 4  ;;  %p404_p2 = pnand %p412_p7, %p708_p3  ;;  %s177_s26 = int_to_ptr.vmem [resolvable:$true] %s176_s26 }
  0x1b   : > { %s162_s28 = scalar_lea.sflag [#allocation4], %s161_s8  ;;  %185 = sbr.rel (%p692_p8) target bundleno = 316 (0x13c), region = 32 }
  0x1c   : > { %406 = dma.hbm_to_vmem [thread:$0]  (!%p404_p2), %s175_s21, 128, %s177_s26, %s162_s28  }
  0x1d   : > { %s734_s29 = sand.u32 (!%p692_p8), 1, %s595_s13  }
  0x1e   : > { %s384_s4 = sshll.u32 (!%p692_p8), %s734_s29, 3  ;;  %s188_s7 = scalar_lea.sflag (!%p692_p8), [#allocation4], %s734_s29 }
  0x1f   : > { %s191_s9 = scalar_lea.vmem (!%p692_p8), [#allocation3], %s384_s4 }
  0x20   : > { %578 = dma.done.wait (%p679_p4), %s188_s7, 128  }
  0x21   : > { %580 = vsyncadd (%p679_p4), %s188_s7, 4294967168 }
  0x22   : > { %582 = dma.done.wait (%p669_p1), [#allocation7], 64  }
  0x23   : > { %584 = vsyncadd (%p669_p1), [#allocation7], 4294967232  ;;  %v614_v0 = vmov 0.0   ;;  %v226_v1 = vld [vmem:[%s191_s9] sm:$0xf]  ;;  %vm237_vm0 = vcmask 1043456   ;;  %v245_v10 = vlaneseq  ;;  %s284_s27 = scalar_lea.hbm %s791_s3, %s603_s15 }
  0x24   : > { %224 = vst [vmem:[#allocation2] sm:$0xf] %v614_v0  ;;  %v230_v4 = vld [vmem:[%s191_s9 + $0x4] sm:$0xf]  ;;  %v242_v9 = vld [vmem:[#allocation6] sm:$0xf] }
  0x25   : > { %386 = vmatpush.msk.msra.mxu0 %vm237_vm0, %v242_v9  ;;  %v246_v11 = vand.u32 127, %v245_v10  ;;  %vm248_vm1 = vcmask 31744   ;;  %v243_v15 = vld [vmem:[%s790_s2] sm:$0x1]  ;;  %s218_s11 = scalar_lea.vmem [#allocation8], %s734_s29  ;;  %s288_s19 = sshll.u32 %s284_s27, 4  ;;  %s289_s19 = int_to_ptr.hbm [resolvable:$true] %s288_s19 }
  0x26   : > { %s286_s18 = sshll.u32 %s218_s11, 4  ;;  %s276_s24 = scalar_lea.sflag [#allocation5], %s734_s29  ;;  %s287_s18 = int_to_ptr.vmem [resolvable:$true] %s286_s18 }
  0x27   : > { %s539_s25 = sshra.s32 %s289_s19, 4  ;;  %s545_s28 = scalar_lea.hbm %s791_s3, 2  ;;  %s540_s25 = int_to_ptr.hbm [resolvable:$true] %s539_s25 }
  0x28   : > { %s541_s26 = scalar_lea.hbm %s540_s25, 1  ;;  %p546_p11 = scmp.lt.s32.totalorder %s540_s25, %s791_s3 }
  0x29   : > { %p542_p1 = scmp.ne.s32.totalorder %s540_s25, %s541_s26  ;;  %p547_p12 = scmp.lt.s32.totalorder %s545_s28, %s541_s26 }
  0x2b   : > { %v225_v2 = vld [vmem:[#allocation2] sm:$0xf]  ;;  %p543_p4 = pnand %p542_p1, %p714_p5  ;;  %p548_p13 = por %p547_p12, %p546_p11 }
  0x2c   : > { %v227_v3 = vadd.f32 %v226_v1, %v225_v2 }
  0x2d   : > { %p544_p8 = pneg %p543_p4 }
  0x2e   : > { %228 = vst [vmem:[#allocation2] sm:$0xf] %v227_v3 }
  0x2f   : > { %p549_p0 = pnand %p548_p13, %p544_p8 }
  0x35   : > { %v229_v5 = vld [vmem:[#allocation2] sm:$0xf] }
  0x36   : > { %v231_v6 = vadd.f32 %v230_v4, %v229_v5 }
  0x38   : > { %232 = vst [vmem:[#allocation2] sm:$0xf] %v231_v6 }
  0x3f   : > { %v236_v7 = vld [vmem:[#allocation2] sm:$0xf] }
  0x40   : > { %v238_v8 = vsel %vm237_vm0, %v236_v7, 0.0 }
  0x41   : > { %239 = vadd.xlane.f32.xlu0 %v238_v8 }
  0xb4   : > { %v240_v12 = vpop.xlane.xlu0 %239 }
  0xb5   : > { %v241_v13 = vmul.f32 0.00390625, %v240_v12 }
  0xb7   : > { %v247_v14 = vperm.slane %v241_v13, %v246_v11 }
  0xb9   : > { %387 = vmatmul.msk.f32.vlgmr.msra.gmra.mxu0 %vm248_vm1, %v247_v14 }
 0x136   : > { %v271_v16 = vpop.f32.mrf.mxu0 }
 0x137   : > { %v272_v17 = vadd.f32 %v271_v16, %v243_v15 }
 0x139   : > { %274 = vst [vmem:[%s218_s11] sm:$0x1] %v272_v17 }
 0x13a   : > { %552 = shalt.err (!%p549_p0)
}
 0x13b   : > { %397 = dma.vmem_to_hbm [thread:$0]  (%p714_p5), %s287_s18, 16, %s289_s19, %s276_s24  }
 0x13c PF: > { %s300_s29 = sand.u32 1, %s591_s12   ;;  %p408_p3 = pnand %p379_p9, %p684_p6 }
 0x13d   : > { %s301_s9 = scalar_lea.sflag [#allocation5], %s300_s29 }
 0x13e   : > { %p409_p7 = pneg %p408_p3 }
 0x140   : > { %586 = dma.done.wait (%p409_p7), %s301_s9, 16  }
 0x141   : > { %588 = vsyncadd (%p409_p7), %s301_s9, 4294967280  ;;  %s20_s17 = sadd.s32 1, %s611_s17   ;;  %s799_s12 = smov %s595_s13 }
 0x142   : > { %p17_p10 = scmp.ge.s32.totalorder %s20_s17, 4   ;;  %s800_s13 = smov %s599_s14 }
 0x143   : > { %s801_s14 = smov %s723_s10  ;;  %s802_s15 = smov %s607_s16 }
 0x144   : > { %s803_s16 = smov %s805_s30  ;;  %19 = sbr.rel (!%p17_p10) target bundleno = 7 (0x7), region = 89 }
 0x149   :  { %306 = vsyncpa [#allocation4], 1 }
 0x14a   :  { %308 = vsyncpa [#allocation4 + $0x1], 1 }
 0x14b   :  { %309 = vsyncpa [#allocation7], 1 }
 0x14c   :  { %310 = vsyncpa [#allocation5], 1 }
 0x14d   :  { %312 = vsyncpa [#allocation5 + $0x1], 1 }

</bundles_post_ra>
